<compile_context>
chip_gen: v6e
topology: v6e:2x2x1
jax: 0.10.0
libtpu: 0.0.40
codegen_flags: <defaults>
</compile_context>

<pallas_src>
import math

import jax
import jax.numpy as jnp
from jax.experimental import pallas as pl
from jax.experimental.pallas import tpu as pltpu


def _round_up(v: int, m: int) -> int:
    return ((v + m - 1) // m) * m


def _predictor_kernel(x_ref, w_ref, b_ref, out_ref):
    # Single fused MXU matmul for both heads; f32 accumulation + f32 bias add,
    # cast only at the final store.
    acc = jnp.dot(x_ref[...], w_ref[...], preferred_element_type=jnp.float32)
    out_ref[...] = (acc + b_ref[...]).astype(out_ref.dtype)


def fuse_params(w_cls, b_cls, w_bbox, b_bbox, *, weight_dtype=None):
    """Build the fused, K/lane-padded weight and bias ONCE at init.

    w_cls:  (C, num_classes)      b_cls:  (num_classes,)
    w_bbox: (C, 4*num_classes)    b_bbox: (4*num_classes,)

    Returns (w_fused, b_fused, num_cls_out, num_bbox_out) where
      w_fused: (round_up(C,128), round_up(nc+nb,128))      weight dtype
      b_fused: (1, round_up(nc+nb,128))                    f32
    """
    c, nc = w_cls.shape
    nb = w_bbox.shape[1]
    if weight_dtype is None:
        # Pass jnp.bfloat16 here on v6e/v7x to halve weight HBM traffic; the
        # kernel still accumulates in f32 so numerics stay close to f32.
        weight_dtype = w_cls.dtype

    c_pad = _round_up(c, 128)
    out_pad = _round_up(nc + nb, 128)

    w_fused = jnp.zeros((c_pad, out_pad), dtype=weight_dtype)
    w_fused = w_fused.at[:c, :nc].set(w_cls.astype(weight_dtype))
    w_fused = w_fused.at[:c, nc:nc + nb].set(w_bbox.astype(weight_dtype))

    # Bias kept in f32: added to the f32 MXU accumulator inside the kernel
    # (important on v5e which has no bf16 VPU path).
    b_fused = jnp.zeros((1, out_pad), dtype=jnp.float32)
    b_fused = b_fused.at[0, :nc].set(b_cls.astype(jnp.float32))
    b_fused = b_fused.at[0, nc:nc + nb].set(b_bbox.astype(jnp.float32))
    return w_fused, b_fused, nc, nb


def fast_rcnn_predictor(x, w_fused, b_fused, num_classes_out, num_bbox_out,
                        *, block_rows=256):
    """Pallas-backed FastRCNNPredictor forward using fused/padded params.

    x: (N, C) or (N, C, 1, 1). Returns (scores, bbox_deltas).
    """
    if x.ndim == 4:
        assert x.shape[2:] == (1, 1), (
            f"x has the wrong shape, expecting the last two dimensions to be "
            f"[1,1] instead of {list(x.shape[2:])}")
    # flatten(start_dim=1) in the wrapper; C stays the (lane) minor dim.
    x2d = x.reshape(x.shape[0], -1)
    n, c = x2d.shape

    c_pad, out_pad = w_fused.shape
    assert c <= c_pad, "fused weight K-dim smaller than input channels"
    out_dtype = x2d.dtype

    # Row tile: full (8-rounded) batch when small, else `block_rows`-row tiles
    # so BlockSpec can pipeline x / output against the MXU for large RoI counts.
    tm = block_rows
    if n <= tm:
        tm = max(8, _round_up(n, 8))
    n_pad = _round_up(n, tm)
    grid_n = n_pad // tm

    # Zero-pad x rows (to the row tile) and columns (K to multiple of 128).
    # Zero rows/cols contribute nothing numerically.
    x_p = jnp.zeros((n_pad, c_pad), dtype=x2d.dtype)
    x_p = x_p.at[:n, :c].set(x2d)
    if w_fused.dtype != x_p.dtype:
        # bf16-weights path: feed the MXU matching dtypes; accumulation is f32.
        x_p = x_p.astype(w_fused.dtype)

    flops = 2 * n_pad * c_pad * out_pad
    bytes_accessed = (x_p.size * x_p.dtype.itemsize
                      + w_fused.size * w_fused.dtype.itemsize
                      + b_fused.size * b_fused.dtype.itemsize
                      + n_pad * out_pad * x2d.dtype.itemsize)

    fused_out = pl.pallas_call(
        _predictor_kernel,
        out_shape=jax.ShapeDtypeStruct((n_pad, out_pad), out_dtype),
        grid=(grid_n,),
        in_specs=[
            pl.BlockSpec((tm, c_pad), lambda i: (i, 0)),       # x row tile
            pl.BlockSpec((c_pad, out_pad), lambda i: (0, 0)),  # fused weight
            pl.BlockSpec((1, out_pad), lambda i: (0, 0)),      # fused bias
        ],
        out_specs=pl.BlockSpec((tm, out_pad), lambda i: (i, 0)),
        compiler_params=pltpu.CompilerParams(
            dimension_semantics=("parallel",)),
        cost_estimate=pl.CostEstimate(
            flops=flops, transcendentals=0, bytes_accessed=bytes_accessed),
    )(x_p, w_fused, b_fused)

    # Strip row/lane padding and split the two heads (free slices).
    fused_out = fused_out[:n]
    scores = fused_out[:, :num_classes_out]
    bbox_deltas = fused_out[:, num_classes_out:num_classes_out + num_bbox_out]
    return scores, bbox_deltas


def init_params(key, in_channels, num_classes, dtype=jnp.float32):
    """Deterministic kaiming_uniform-style init (matches initialize_fc_layer
    shapes: cls_score (num_classes, C), bbox_pred (4*num_classes, C)); weights
    are stored transposed (C, out) for the kernel."""
    k_wc, k_bc, k_wb, k_bb = jax.random.split(key, 4)
    bound_w = math.sqrt(6.0 / in_channels)
    bound_b = 1.0 / math.sqrt(in_channels)
    w_cls = jax.random.uniform(k_wc, (in_channels, num_classes),
                               dtype, -bound_w, bound_w)
    b_cls = jax.random.uniform(k_bc, (num_classes,), dtype, -bound_b, bound_b)
    w_bbox = jax.random.uniform(k_wb, (in_channels, num_classes * 4),
                                dtype, -bound_w, bound_w)
    b_bbox = jax.random.uniform(k_bb, (num_classes * 4,), dtype,
                                -bound_b, bound_b)
    return w_cls, b_cls, w_bbox, b_bbox


if __name__ == "__main__":
    key = jax.random.PRNGKey(0)
    k_x, k_p = jax.random.split(key)

    batch = 2
    in_channels = 32
    num_classes = 8

    # Input shaped like RoI-pooled features after avgpool: (N, C, 1, 1) NCHW.
    x = jax.random.normal(k_x, (batch, in_channels, 1, 1), dtype=jnp.float32)
    w_cls, b_cls, w_bbox, b_bbox = init_params(k_p, in_channels, num_classes)

    # Fuse + pad params once at init (not per call).
    w_fused, b_fused, nc, nb = fuse_params(w_cls, b_cls, w_bbox, b_bbox)

    scores, bbox_deltas = fast_rcnn_predictor(x, w_fused, b_fused, nc, nb)
    jax.block_until_ready((scores, bbox_deltas))

    # Reference check in plain JAX.
    x2d = x.reshape(batch, -1)
    ref_scores = x2d @ w_cls + b_cls
    ref_bbox = x2d @ w_bbox + b_bbox
    assert scores.shape == (batch, num_classes)
    assert bbox_deltas.shape == (batch, num_classes * 4)
    assert jnp.allclose(scores, ref_scores, atol=1e-5)
    assert jnp.allclose(bbox_deltas, ref_bbox, atol=1e-5)

    print("KERNEL_OK")
</pallas_src>

<mosaic_0001>
module attributes {stable_mosaic.version = 11 : i64} {
  func.func @_predictor_kernel(%arg0: i32, %arg1: memref<8x128xf32, #tpu.memory_space<vmem>>, %arg2: memref<128x128xf32, #tpu.memory_space<vmem>>, %arg3: memref<1x128xf32, #tpu.memory_space<vmem>>, %arg4: memref<8x128xf32, #tpu.memory_space<vmem>>) attributes {dimension_semantics = [#tpu.dimension_semantics<parallel>], iteration_bounds = array<i64: 1>, scalar_prefetch = 0 : i64, scratch_operands = 0 : i64, tpu.core_type = #tpu.core_type<tc>, window_params = [{transform_indices = @transform_0, window_bounds = array<i64: 8, 128>}, {pipeline_mode = #tpu.pipeline_mode<synchronous>, transform_indices = @transform_1, window_bounds = array<i64: 128, 128>}, {pipeline_mode = #tpu.pipeline_mode<synchronous>, transform_indices = @transform_2, window_bounds = array<i64: 1, 128>}, {transform_indices = @transform_3, window_bounds = array<i64: 8, 128>}]} {
    %c0 = arith.constant 0 : index
    %c0_0 = arith.constant 0 : index
    %0 = vector.load %arg1[%c0, %c0_0] : memref<8x128xf32, #tpu.memory_space<vmem>>, vector<8x128xf32>
    %c0_1 = arith.constant 0 : index
    %c0_2 = arith.constant 0 : index
    %1 = vector.load %arg2[%c0_1, %c0_2] : memref<128x128xf32, #tpu.memory_space<vmem>>, vector<128x128xf32>
    %cst = arith.constant dense<0.000000e+00> : vector<8x128xf32>
    %2 = tpu.matmul %0, %1, %cst {dimension_numbers = #tpu.dot_dimension_numbers<[1], [0], [0], [1], [0, 0, 1, 1], [], []>} : vector<8x128xf32>, vector<128x128xf32>, vector<8x128xf32> -> vector<8x128xf32>
    %c0_3 = arith.constant 0 : index
    %c0_4 = arith.constant 0 : index
    %3 = vector.load %arg3[%c0_3, %c0_4] : memref<1x128xf32, #tpu.memory_space<vmem>>, vector<1x128xf32>
    %4 = vector.broadcast %3 : vector<1x128xf32> to vector<8x128xf32>
    %5 = arith.addf %2, %4 : vector<8x128xf32>
    %c0_5 = arith.constant 0 : index
    %c0_6 = arith.constant 0 : index
    %6 = vector.load %arg4[%c0_5, %c0_6] : memref<8x128xf32, #tpu.memory_space<vmem>>, vector<8x128xf32>
    tpu.vector_store %arg4[%c0_5, %c0_6], %5 {strides = array<i32>} : memref<8x128xf32, #tpu.memory_space<vmem>>, vector<8x128xf32>,
    return
  }
  func.func @transform_0(%arg0: i32) -> (i32, i32) {
    %c0_i32 = arith.constant 0 : i32
    %c0_i32_0 = arith.constant 0 : i32
    return %arg0, %c0_i32 : i32, i32
  }
  func.func @transform_1(%arg0: i32) -> (i32, i32) {
    %c0_i32 = arith.constant 0 : i32
    %c0_i32_0 = arith.constant 0 : i32
    %c0_i32_1 = arith.constant 0 : i32
    return %c0_i32, %c0_i32_0 : i32, i32
  }
  func.func @transform_2(%arg0: i32) -> (i32, i32) {
    %c0_i32 = arith.constant 0 : i32
    %c0_i32_0 = arith.constant 0 : i32
    %c0_i32_1 = arith.constant 0 : i32
    return %c0_i32, %c0_i32_0 : i32, i32
  }
  func.func @transform_3(%arg0: i32) -> (i32, i32) {
    %c0_i32 = arith.constant 0 : i32
    %c0_i32_0 = arith.constant 0 : i32
    return %arg0, %c0_i32 : i32, i32
  }
}

</mosaic_0001>

<bundles_post_ra>
// kernel: tpu_custom_call.1
= control target key start
LH: loop header
LB: loop body
LE: loop exit
PB: predicated region body
PF: predicated region fallthrough
CT: control target
= control target key end

     0   :  { %8 = vsyncpa [#allocation3], 0  ;;  %s317_s0 = inlined_call_operand.hbm [shape: f32[8,128], index: 0, kind: input, shape index: {}]   ;;  %s318_s1 = inlined_call_operand.hbm [shape: f32[128,128], index: 1, kind: input, shape index: {}]   ;;  %s319_s2 = inlined_call_operand.vmem [shape: f32[1,128], index: 2, kind: input, shape index: {}]   ;;  %s320_s3 = inlined_call_operand.hbm [shape: f32[8,128], index: 3, kind: output, shape index: {}]  }
   0x1   :  { %9 = vsyncpa [#allocation6], 0 }
   0x2   :  { %10 = vsyncpa [#allocation4], 0  ;;  %s278_s12 = smov [#allocation2]   ;;  %s279_s14 = smov [#allocation5]  }
   0x3   :  { %s17_s13 = sshll.u32 %s278_s12, 4  ;;  %s26_s15 = sshll.u32 %s279_s14, 4  ;;  %s18_s13 = int_to_ptr.vmem [resolvable:$true] %s17_s13  ;;  %s27_s15 = int_to_ptr.vmem [resolvable:$true] %s26_s15 }
   0x4   :  { %s220_s16 = scalar_lea.vmem %s18_s13, 128  ;;  %p225_p1 = scmp.lt.s32.totalorder %s18_s13, %s18_s13 }
   0x5   :  { %p221_p0 = scmp.ne.s32.totalorder %s18_s13, %s220_s16  ;;  %p226_p2 = scmp.lt.s32.totalorder %s220_s16, %s220_s16 }
   0x7   :  { %p227_p3 = por %p226_p2, %p225_p1 }
   0x9   :  { %p228_p4 = pnand %p227_p3, %p221_p0 }
   0xb   :  { %231 = shalt.err (!%p228_p4)
}
   0xc   :  { %20 = dma.hbm_to_vmem [thread:$0]  %s317_s0, 128, %s18_s13, [#allocation3]  }
   0xd   :  { %s240_s19 = scalar_lea.vmem %s27_s15, 2048  ;;  %p245_p6 = scmp.lt.s32.totalorder %s27_s15, %s27_s15 }
   0xe   :  { %p241_p5 = scmp.ne.s32.totalorder %s27_s15, %s240_s19  ;;  %p246_p7 = scmp.lt.s32.totalorder %s240_s19, %s240_s19 }
  0x10   :  { %p247_p8 = por %p246_p7, %p245_p6 }
  0x12   :  { %p248_p9 = pnand %p247_p8, %p241_p5 }
  0x14   :  { %251 = shalt.err (!%p248_p9)
}
  0x15   :  { %s280_s20 = smov 128   ;;  %s281_s21 = smov 8  }
  0x16   :  { %32 = dma.hbm_to_vmem [thread:$0]  %s318_s1, 2048, %s27_s15, [#allocation6], %s280_s20, %s280_s20, %s281_s21  }
  0x17   :  { %272 = dma.done.wait [#allocation3], 128  }
  0x18   :  { %273 = vsyncadd [#allocation3], 4294967168 }
  0x19   :  { %274 = dma.done.wait [#allocation6], 2048  }
  0x1a   :  { %275 = vsyncadd [#allocation6], 4294965248  ;;  %v282_v0 = vmov 0.0   ;;  %vm283_vm0 = vmmov 0   ;;  %v57_v1 = vld [vmem:[#allocation5 + $0x78] sm:$0xff]  ;;  %v56_v2 = vld [vmem:[#allocation5 + $0x70] sm:$0xff] }
  0x1b   :  { %170 = vmatprep.subr.mxu0 %v282_v0  ;;  %202 = vmatprep.mubr.msk.f32.mxu0 %vm283_vm0, %v282_v0  ;;  %v55_v3 = vld [vmem:[#allocation5 + $0x68] sm:$0xff]  ;;  %v54_v4 = vld [vmem:[#allocation5 + $0x60] sm:$0xff]  ;;  %v53_v5 = vld [vmem:[#allocation5 + $0x58] sm:$0xff]  ;;  %s284_s24 = smov [#allocation7]  }
  0x1c   :  { %171 = vmatpush3.msra.mxu0 %v57_v1  ;;  %v52_v6 = vld [vmem:[#allocation5 + $0x50] sm:$0xff]  ;;  %v51_v7 = vld [vmem:[#allocation5 + $0x48] sm:$0xff]  ;;  %v50_v8 = vld [vmem:[#allocation5 + $0x40] sm:$0xff]  ;;  %s142_s25 = sshll.u32 %s284_s24, 4  ;;  %s143_s25 = int_to_ptr.vmem [resolvable:$true] %s142_s25 }
  0x1d   :  { %172 = vmatprep.subr.mxu0 %v282_v0  ;;  %v49_v9 = vld [vmem:[#allocation5 + $0x38] sm:$0xff]  ;;  %v48_v10 = vld [vmem:[#allocation5 + $0x30] sm:$0xff]  ;;  %v47_v11 = vld [vmem:[#allocation5 + $0x28] sm:$0xff]  ;;  %s252_s26 = scalar_lea.vmem %s143_s25, 128  ;;  %p257_p11 = scmp.lt.s32.totalorder %s143_s25, %s143_s25 }
  0x1e   :  { %173 = vmatpush3.msra.mxu0 %v56_v2  ;;  %v46_v12 = vld [vmem:[#allocation5 + $0x20] sm:$0xff]  ;;  %v45_v13 = vld [vmem:[#allocation5 + $0x18] sm:$0xff]  ;;  %v44_v14 = vld [vmem:[#allocation5 + $0x10] sm:$0xff]  ;;  %p253_p10 = scmp.ne.s32.totalorder %s143_s25, %s252_s26  ;;  %p258_p12 = scmp.lt.s32.totalorder %s252_s26, %s252_s26 }
  0x1f   :  { %174 = vmatprep.subr.mxu0 %v282_v0  ;;  %v43_v15 = vld [vmem:[#allocation5 + $0x8] sm:$0xff]  ;;  %v42_v16 = vld [vmem:[#allocation5] sm:$0xff]  ;;  %v41_v17 = vld [vmem:[#allocation2] sm:$0xff] }
  0x20   :  { %175 = vmatpush3.msra.mxu0 %v55_v3  ;;  %v152_v18 = vld [vmem:[%s319_s2] ss:$0 sm:$0xff]  ;;  %p259_p13 = por %p258_p12, %p257_p11 }
  0x21   :  { %176 = vmatprep.subr.mxu0 %v282_v0 }
  0x22   :  { %177 = vmatpush3.msra.mxu0 %v54_v4  ;;  %p260_p0 = pnand %p259_p13, %p253_p10 }
  0x23   :  { %178 = vmatprep.subr.mxu0 %v282_v0 }
  0x24   :  { %179 = vmatpush3.msra.mxu0 %v53_v5 }
  0x25   :  { %180 = vmatprep.subr.mxu0 %v282_v0 }
  0x26   :  { %181 = vmatpush3.msra.mxu0 %v52_v6 }
  0x27   :  { %182 = vmatprep.subr.mxu0 %v282_v0 }
  0x28   :  { %183 = vmatpush3.msra.mxu0 %v51_v7 }
  0x29   :  { %184 = vmatprep.subr.mxu0 %v282_v0 }
  0x2a   :  { %185 = vmatpush3.msra.mxu0 %v50_v8 }
  0x2b   :  { %186 = vmatprep.subr.mxu0 %v282_v0 }
  0x2c   :  { %187 = vmatpush3.msra.mxu0 %v49_v9 }
  0x2d   :  { %188 = vmatprep.subr.mxu0 %v282_v0 }
  0x2e   :  { %189 = vmatpush3.msra.mxu0 %v48_v10 }
  0x2f   :  { %190 = vmatprep.subr.mxu0 %v282_v0 }
  0x30   :  { %191 = vmatpush3.msra.mxu0 %v47_v11 }
  0x31   :  { %192 = vmatprep.subr.mxu0 %v282_v0 }
  0x32   :  { %193 = vmatpush3.msra.mxu0 %v46_v12 }
  0x33   :  { %194 = vmatprep.subr.mxu0 %v282_v0 }
  0x34   :  { %195 = vmatpush3.msra.mxu0 %v45_v13 }
  0x35   :  { %196 = vmatprep.subr.mxu0 %v282_v0 }
  0x36   :  { %197 = vmatpush3.msra.mxu0 %v44_v14 }
  0x37   :  { %198 = vmatprep.subr.mxu0 %v282_v0 }
  0x38   :  { %199 = vmatpush3.msra.mxu0 %v43_v15 }
  0x39   :  { %200 = vmatprep.subr.mxu0 %v282_v0 }
  0x3a   :  { %201 = vmatpush3.msra.mxu0 %v42_v16 }
  0x3b   :  { %203 = vmatmul.mubr.f32.vlgmr.msra.gmra.mxu0 %v41_v17 }
  0xfb   :  { %v131_v19 = vpop.f32.mrf.mxu0 }
  0xfc   :  { %v132_v20 = vadd.f32 %v152_v18, %v131_v19 }
  0xfd   :  { %v204_v21 = vpop.f32.mrf.mxu0 }
  0xfe   :  { %135 = vst [vmem:[#allocation7] sm:$0xff] %v132_v20 }
  0xff   :  { %263 = shalt.err (!%p260_p0)
}
 0x100   :  { %145 = dma.vmem_to_hbm [thread:$0]  %s143_s25, 128, %s320_s3, [#allocation4]  }
 0x101   :  { %276 = dma.done.wait [#allocation4], 128  }
 0x102   :  { %277 = vsyncadd [#allocation4], 4294967168 }
 0x103   :  { %149 = vsyncpa [#allocation3], 1 }
 0x104   :  { %150 = vsyncpa [#allocation6], 1 }
 0x105   :  { %151 = vsyncpa [#allocation4], 1 }

</bundles_post_ra>
